<compile_context>
chip_gen: v7x
topology: tpu7x:2x2x1
jax: 0.10.0
libtpu: 0.0.40
codegen_flags: <defaults>
</compile_context>

<pallas_src>
import jax
import jax.numpy as jnp
from jax.experimental import pallas as pl
from jax.experimental.pallas import tpu as pltpu


_GRAY_W = (0.299, 0.587, 0.114)  # ITU-R 601-2 luma transform (PIL convention)
_BOUND = 255.0                   # images assumed in [0, 255]
# TODO(synk): if the original `function.color` uses different grayscale weights
# or a [0, 1] float bound, adjust _GRAY_W / _BOUND accordingly.


def _color_kernel(scal_ref, x_ref, o_ref):
    # scal_ref: (2,) float32 in SMEM -> [factor, apply_flag]
    # x_ref / o_ref: (1, 3, TL) tile: channels on sublanes, spatial on lanes.
    factor = scal_ref[0]
    apply_flag = scal_ref[1]

    x = x_ref[...].astype(jnp.float32)
    gray = (_GRAY_W[0] * x[:, 0, :]
            + _GRAY_W[1] * x[:, 1, :]
            + _GRAY_W[2] * x[:, 2, :])[:, None, :]          # (1, 1, TL)
    blended = jnp.clip(gray + factor * (x - gray), 0.0, _BOUND)
    out = jnp.where(apply_flag > 0.5, blended, x)            # exact identity when gated off
    o_ref[...] = out.astype(o_ref.dtype)


def color_pallas(image, factor, apply_flag, *, target_block_bytes=2 << 20):
    """image: (N, 3, H, W); factor, apply_flag: scalar (traced ok)."""
    N, C, H, W = image.shape
    assert C == 3, "Color expects RGB (C == 3) images in NCHW layout"
    L = H * W
    x = image.reshape(N, C, L)
    itemsize = jnp.dtype(image.dtype).itemsize

    # Lane-dense spatial tile: a multiple of 128 that divides L, sized toward
    # ~target_block_bytes per block; fall back to the full last dim otherwise.
    if L % 128 == 0:
        tl = min(L, max(128, (target_block_bytes // (C * itemsize)) // 128 * 128))
        while L % tl != 0:
            tl -= 128
    else:
        tl = L
    grid = (N, L // tl)

    scal = jnp.stack([jnp.asarray(factor, jnp.float32),
                      jnp.asarray(apply_flag, jnp.float32)])

    out = pl.pallas_call(
        _color_kernel,
        out_shape=jax.ShapeDtypeStruct((N, C, L), image.dtype),
        grid_spec=pltpu.PrefetchScalarGridSpec(
            num_scalar_prefetch=0,
            grid=grid,
            in_specs=[
                pl.BlockSpec(memory_space=pltpu.MemorySpace.SMEM),     # scalars
                pl.BlockSpec((1, C, tl), lambda n, l: (n, 0, l)),      # image tile
            ],
            out_specs=pl.BlockSpec((1, C, tl), lambda n, l: (n, 0, l)),
        ),
        compiler_params=pltpu.CompilerParams(
            dimension_semantics=("parallel", "parallel"),
            vmem_limit_bytes=32 << 20,
        ),
        cost_estimate=pl.CostEstimate(
            flops=8 * N * C * L,
            transcendentals=0,
            bytes_accessed=2 * N * C * L * itemsize,
        ),
    )(scal, x)

    return out.reshape(N, C, H, W)


class Color:
    """JAX/Pallas port of the torch Color augmentation (saturation blend)."""

    def __init__(self, p, magnitude, minus=True):
        self.p = float(p)
        self.magnitude = float(magnitude)
        self.minus = bool(minus)

    def __call__(self, image, key):
        k1, k2 = jax.random.split(key)
        # random sign flip and p-gate decided on device (jittable, no host sync)
        flip = jnp.logical_and(self.minus, jax.random.uniform(k1, ()) < 0.5)
        sign = jnp.where(flip, -1.0, 1.0)
        factor = 1.0 + sign * self.magnitude
        apply_flag = (jax.random.uniform(k2, ()) < self.p).astype(jnp.float32)
        return color_pallas(image, factor, apply_flag)


if __name__ == "__main__":
    key = jax.random.PRNGKey(0)
    data_key, aug_key = jax.random.split(key)

    N, C, H, W = 2, 3, 16, 16
    image = jax.random.uniform(
        data_key, (N, C, H, W), dtype=jnp.float32, minval=0.0, maxval=255.0
    )

    aug = Color(p=1.0, magnitude=0.5, minus=True)
    out = jax.block_until_ready(aug(image, aug_key))

    assert out.shape == image.shape and out.dtype == image.dtype

    # pure-JAX reference, replaying the same RNG decisions
    k1, k2 = jax.random.split(aug_key)
    flip = jnp.logical_and(True, jax.random.uniform(k1, ()) < 0.5)
    sign = jnp.where(flip, -1.0, 1.0)
    factor = 1.0 + sign * 0.5
    applied = jax.random.uniform(k2, ()) < 1.0

    def ref(img, f):
        gray = (0.299 * img[:, 0] + 0.587 * img[:, 1] + 0.114 * img[:, 2])[:, None]
        return jnp.clip(gray + f * (img - gray), 0.0, 255.0)

    expected = jnp.where(applied, ref(image, factor), image)
    assert jnp.allclose(out, expected, atol=1e-3, rtol=1e-5), "mismatch vs reference"

    print("KERNEL_OK")
</pallas_src>

<mosaic_0001>
module attributes {stable_mosaic.version = 11 : i64} {
  func.func @_color_kernel(%arg0: i32, %arg1: i32, %arg2: memref<2xf32, #tpu.memory_space<smem>>, %arg3: memref<1x3x256xf32, #tpu.memory_space<vmem>>, %arg4: memref<1x3x256xf32, #tpu.memory_space<vmem>>) attributes {dimension_semantics = [#tpu.dimension_semantics<parallel>, #tpu.dimension_semantics<parallel>], iteration_bounds = array<i64: 2, 1>, scalar_prefetch = 0 : i64, scratch_operands = 0 : i64, tpu.core_type = #tpu.core_type<tc>, window_params = [{transform_indices = @transform_0, window_bounds = array<i64: 2>}, {transform_indices = @transform_1, window_bounds = array<i64: 1, 3, 256>}, {transform_indices = @transform_2, window_bounds = array<i64: 1, 3, 256>}]} {
    %c0 = arith.constant 0 : index
    %0 = memref.load %arg2[%c0] : memref<2xf32, #tpu.memory_space<smem>>
    %c1 = arith.constant 1 : index
    %1 = memref.load %arg2[%c1] : memref<2xf32, #tpu.memory_space<smem>>
    %c0_0 = arith.constant 0 : index
    %c0_1 = arith.constant 0 : index
    %c0_2 = arith.constant 0 : index
    %2 = vector.load %arg3[%c0_0, %c0_1, %c0_2] : memref<1x3x256xf32, #tpu.memory_space<vmem>>, vector<1x3x256xf32>
    %3 = vector.extract_strided_slice %2 {offsets = [0, 0, 0], sizes = [1, 1, 256], strides = [1, 1, 1]} : vector<1x3x256xf32> to vector<1x1x256xf32>
    %4 = vector.shape_cast %3 : vector<1x1x256xf32> to vector<1x256xf32>
    %cst = arith.constant 2.990000e-01 : f32
    %5 = vector.broadcast %cst : f32 to vector<1x256xf32>
    %6 = arith.mulf %5, %4 : vector<1x256xf32>
    %7 = vector.extract_strided_slice %2 {offsets = [0, 1, 0], sizes = [1, 1, 256], strides = [1, 1, 1]} : vector<1x3x256xf32> to vector<1x1x256xf32>
    %8 = vector.shape_cast %7 : vector<1x1x256xf32> to vector<1x256xf32>
    %cst_3 = arith.constant 5.870000e-01 : f32
    %9 = vector.broadcast %cst_3 : f32 to vector<1x256xf32>
    %10 = arith.mulf %9, %8 : vector<1x256xf32>
    %11 = arith.addf %6, %10 : vector<1x256xf32>
    %12 = vector.extract_strided_slice %2 {offsets = [0, 2, 0], sizes = [1, 1, 256], strides = [1, 1, 1]} : vector<1x3x256xf32> to vector<1x1x256xf32>
    %13 = vector.shape_cast %12 : vector<1x1x256xf32> to vector<1x256xf32>
    %cst_4 = arith.constant 1.140000e-01 : f32
    %14 = vector.broadcast %cst_4 : f32 to vector<1x256xf32>
    %15 = arith.mulf %14, %13 : vector<1x256xf32>
    %16 = arith.addf %11, %15 : vector<1x256xf32>
    %17 = vector.shape_cast %16 : vector<1x256xf32> to vector<1x1x256xf32>
    %18 = vector.broadcast %17 : vector<1x1x256xf32> to vector<1x3x256xf32>
    %19 = arith.subf %2, %18 : vector<1x3x256xf32>
    %20 = vector.broadcast %0 : f32 to vector<1x3x256xf32>
    %21 = arith.mulf %20, %19 : vector<1x3x256xf32>
    %22 = vector.broadcast %17 : vector<1x1x256xf32> to vector<1x3x256xf32>
    %23 = arith.addf %22, %21 : vector<1x3x256xf32>
    %cst_5 = arith.constant 0.000000e+00 : f32
    %cst_6 = arith.constant 2.550000e+02 : f32
    %24 = vector.broadcast %cst_5 : f32 to vector<1x3x256xf32>
    %25 = arith.maximumf %24, %23 : vector<1x3x256xf32>
    %26 = vector.broadcast %cst_6 : f32 to vector<1x3x256xf32>
    %27 = arith.minimumf %26, %25 : vector<1x3x256xf32>
    %cst_7 = arith.constant 5.000000e-01 : f32
    %28 = arith.cmpf ogt, %1, %cst_7 : f32
    %29 = arith.select %28, %27, %2 : vector<1x3x256xf32>
    %c0_8 = arith.constant 0 : index
    %c0_9 = arith.constant 0 : index
    %c0_10 = arith.constant 0 : index
    %30 = vector.load %arg4[%c0_8, %c0_9, %c0_10] : memref<1x3x256xf32, #tpu.memory_space<vmem>>, vector<1x3x256xf32>
    tpu.vector_store %arg4[%c0_8, %c0_9, %c0_10], %29 {strides = array<i32>} : memref<1x3x256xf32, #tpu.memory_space<vmem>>, vector<1x3x256xf32>,
    return
  }
  func.func @transform_0(%arg0: i32, %arg1: i32) -> i32 {
    %c0_i32 = arith.constant 0 : i32
    %c0_i32_0 = arith.constant 0 : i32
    return %c0_i32 : i32
  }
  func.func @transform_1(%arg0: i32, %arg1: i32) -> (i32, i32, i32) {
    %c0_i32 = arith.constant 0 : i32
    %c0_i32_0 = arith.constant 0 : i32
    return %arg0, %c0_i32, %arg1 : i32, i32, i32
  }
  func.func @transform_2(%arg0: i32, %arg1: i32) -> (i32, i32, i32) {
    %c0_i32 = arith.constant 0 : i32
    %c0_i32_0 = arith.constant 0 : i32
    return %arg0, %c0_i32, %arg1 : i32, i32, i32
  }
}

</mosaic_0001>

<bundles_post_ra>
// kernel: tpu_custom_call.1
= control target key start
LH: loop header
LB: loop body
LE: loop exit
PB: predicated region body
PF: predicated region fallthrough
CT: control target
= control target key end

     0   :  { %7 = vsyncpa [#allocation3], 0  ;;  %s474_s9 = smov 0   ;;  %s476_s10 = smov 0   ;;  %s540_s0 = inlined_call_operand.vmem [shape: f32[2], index: 0, kind: input, shape index: {}]   ;;  %s541_s1 = inlined_call_operand.vmem [shape: f32[2,3,256], index: 1, kind: input, shape index: {}]   ;;  %s542_s2 = inlined_call_operand.vmem [shape: f32[2,3,256], index: 2, kind: output, shape index: {}]  }
   0x1   :  { %s478_s11 = smov 0  }
   0x2 LB: > { %s361_s12 = sadd.s32 4294967295, %s456_s11   ;;  %s25_s13 = sadd.s32 1, %s452_s10  ;;  %s456_s11 = sphi %s478_s11, %s13_s11   ;;  %s452_s10 = sphi %s476_s10, %s546_s10   ;;  %s448_s9 = sphi %s474_s9, %s545_s9  }
   0x3   : > { %p27_p0 = scmp.ge.s32.totalorder %s25_s13, 2  ;;  %p363_p1 = scmp.ge.s32.totalorder %s456_s11, 1 }
   0x4   : > { %p107_p2 = scmp.lt.s32.totalorder %s456_s11, 3  ;;  %p499_p4 = scmp.eq.s32.totalorder %s361_s12, 0 }
   0x5   : > { %s548_s13 = smov (%p27_p0, %s25_s13), 0  ;;  %s120_s18 = sshll.u32 %s540_s0, 4  ;;  %s121_s18 = int_to_ptr.vmem [resolvable:$true] %s120_s18 }
   0x6   : > { %p495_p3 = pnand %p363_p1, %p107_p2  ;;  %s415_s19 = scalar_lea.vmem %s121_s18, 16 }
   0x7   : > { %p416_p7 = scmp.ne.s32.totalorder %s121_s18, %s415_s19  ;;  %p423_p11 = scmp.lt.s32.totalorder %s121_s18, %s121_s18 }
   0x8   : > { %p383_p5 = pneg %p495_p3  ;;  %p424_p12 = scmp.lt.s32.totalorder %s415_s19, %s415_s19 }
   0xa   : > { %p384_p6 = pnand %p499_p4, %p383_p5  ;;  %p425_p13 = por %p424_p12, %p423_p11 }
   0xc   : > { %p417_p8 = pneg %p384_p6 }
   0xe   : > { %p418_p9 = pnand %p417_p8, %p416_p7 }
  0x10   : > { %p419_p10 = pneg %p418_p9 }
  0x12   : > { %p426_p0 = pnand %p425_p13, %p419_p10 }
  0x14   : > { %429 = shalt.err (!%p426_p0)
}
  0x15   : > { %s458_s20 = smov [#allocation2]   ;;  %146 = sbr.rel (%p495_p3) target bundleno = 67 (0x43), region = 28 }
  0x16   : > { %386 = dma.vmem_to_smem (!%p384_p6), %s121_s18, 16, %s458_s20, [#allocation3]  }
  0x1c   : > { %443 = dma.done.wait (%p499_p4), [#allocation3], 16  }
  0x1d   : > { %445 = vsyncadd (%p499_p4), [#allocation3], 4294967280 }
  0x1e   : > { %152 = sfence }
  0x1f   : > { %p178_p1 = scmp.lt.s32.totalorder %s448_s9, 1  ;;  %v214_v0 = vlaneseq  ;;  %s372_s25 = sld [smem:[#allocation2 + $0x1]] }
  0x20   : > { %s197_s26 = sld [smem:[#allocation2]] }
  0x21   : > { %s550_s9 = smov (!%p178_p1, %s448_s9), 1  ;;  %v215_v2 = vshrl.u32 %v214_v0, 7 }
  0x22   : > { %s377_s21 = sshll.u32 %s550_s9, 3 }
  0x23   : > { %s185_s24 = scalar_lea.vmem %s541_s1, %s377_s21  ;;  %v216_v9 = vsub.s32 0, %v215_v2  ;;  %v220_v10 = vsub.s32 4, %v215_v2  ;;  %s195_s30 = scalar_lea.vmem %s542_s2, %s377_s21 }
  0x24   : > { %v199_v1 = vld [vmem:[%s185_s24] sm:$0x77] }
  0x25   : > { %v200_v3 = vmul.f32 0.299, %v199_v1  ;;  %v201_v4 = vmul.f32 0.587, %v199_v1  ;;  %v207_v5 = vmul.f32 0.114, %v199_v1  ;;  %v253_v27 = vcombine.high %v199_v1, %v199_v1 }
  0x26   : > { %p248_p2 = scmp.gt.f32.partialorder %s372_s25, 0.5  ;;  %v237_v17 = vstv %s197_s26 }
  0x27   : > { %v373_v6 = vrot.slane %v201_v4, 9  ;;  %v374_v7 = vrot.slane %v207_v5, 10 }
  0x28   : > { %s249_s27 = scalar_select %p248_p2, 1, 0 }
  0x29   : > { %v206_v8 = vadd.f32 %v373_v6, %v200_v3 }
  0x2a   : > { %v250_v22 = vstv %s249_s27 }
  0x2b   : > { %v212_v11 = vadd.f32 %v374_v7, %v206_v8  ;;  %vm251_vm0 = vcmp.eq.s32.totalorder %v250_v22, 1 }
  0x2d   : > { %v217_v12 = vrot.slane %v212_v11, %v216_v9  ;;  %v221_v13 = vrot.slane %v212_v11, %v220_v10 }
  0x2f   : > { %v227_v14 = vrot.slane %v217_v12, %v216_v9  ;;  %v231_v15 = vrot.slane %v221_v13, %v216_v9 }
  0x31   : > { %v234_v16 = vcombine.low %v227_v14, %v231_v15 }
  0x33   : > { %v236_v18 = vsub.f32 %v199_v1, %v234_v16 }
  0x35   : > { %v238_v19 = vmul.f32 %v237_v17, %v236_v18 }
  0x37   : > { %v240_v20 = vcombine.high %v238_v19, %v238_v19  ;;  %v242_v21 = vadd.f32 %v238_v19, %v227_v14 }
  0x39   : > { %v243_v23 = vadd.f32 %v240_v20, %v231_v15  ;;  %v244_v24 = vmax.f32 %v242_v21, 0.0 }
  0x3b   : > { %v245_v25 = vmax.f32 %v243_v23, 0.0  ;;  %v246_v26 = vmin.f32 %v244_v24, 255.0 }
  0x3d   : > { %v247_v28 = vmin.f32 %v245_v25, 255.0  ;;  %v255_v29 = vsel %vm251_vm0, %v246_v26, %v199_v1 }
  0x3f   : > { %v256_v30 = vsel %vm251_vm0, %v247_v28, %v253_v27 }
  0x40   : > { %v259_v31 = vcombine.low %v255_v29, %v256_v30 }
  0x42   : > { %261 = vst [vmem:[%s195_s30] sm:$0x77] %v259_v31 }
  0x43 PF: > { %s13_s11 = sadd.s32 1, %s456_s11   ;;  %s545_s9 = smov %s452_s10 }
  0x44   : > { %p10_p3 = scmp.ge.s32.totalorder %s13_s11, 4   ;;  %s546_s10 = smov %s548_s13 }
  0x46   :  { %12 = sbr.rel (!%p10_p3) target bundleno = 2 (0x2), region = 63 }
  0x4d   :  { %292 = vsyncpa [#allocation3], 1 }
  0x4e   :  { %294 = vsyncpa [#allocation3 + $0x1], 1 }

</bundles_post_ra>
